<compile_context>
chip_gen: v7x
topology: tpu7x:2x2x1
jax: 0.10.0
libtpu: 0.0.40
codegen_flags: <defaults>
</compile_context>

<pallas_src>
import math
import functools

import jax
import jax.numpy as jnp
from jax.experimental import pallas as pl
from jax.experimental.pallas import tpu as pltpu

_INV_SQRT2 = 1.0 / math.sqrt(2.0)


def _round_up(x, m):
    return ((x + m - 1) // m) * m


def _proj_gelu_kernel(x_ref, wt_ref, b_ref, o_ref):
    # x_ref: (C_in, tl)   wt_ref: (C_out, C_in)   b_ref: (C_out, 1)   o_ref: (C_out, tl)
    acc = jnp.dot(wt_ref[...], x_ref[...], preferred_element_type=jnp.float32)
    acc = acc + b_ref[...]                      # bias already f32, broadcast over lanes
    # Exact (erf-based) GELU == torch.nn.GELU() default.
    # TODO(synk): on v7x the erf VALU polynomial can become the binding unit;
    # tanh-approx GELU (EUP) is ~2-3x cheaper there but changes results ~1e-3
    # and needs sign-off, so exact erf is kept for torch parity.
    gelu = 0.5 * acc * (1.0 + jax.lax.erf(acc * _INV_SQRT2))
    o_ref[...] = gelu.astype(o_ref.dtype)


@functools.partial(jax.jit, static_argnames=("tl",))
def conv_projection_layer(x_ncl, weight, bias, *, tl=32768):
    """ConvTranspose1d(k=1, s=1, p=0) + GELU computed directly in NCL layout.

    x_ncl:  (N, C_in, L)
    weight: (C_in, C_out, 1)   -- PyTorch ConvTranspose1d layout
    bias:   (C_out,)
    """
    # TODO(synk): only kernel_size=1 / stride=1 / padding=0 (the module defaults)
    # and actv='gelu' are implemented; general ConvTranspose1d strides are not.
    n, c_in, length = x_ncl.shape
    c_out = weight.shape[1]
    itemsize = jnp.dtype(x_ncl.dtype).itemsize

    wt = jnp.transpose(weight[:, :, 0], (1, 0)).astype(x_ncl.dtype)   # (C_out, C_in)
    b2d = bias.reshape(c_out, 1).astype(jnp.float32)                  # (C_out, 1)

    # Lane-dense tile along L, forced to a multiple of 128 and clamped to L.
    tl = _round_up(max(int(tl), 128), 128)
    if n == 1 and length > 128:
        # v7x megacore: ensure >= 2 grid steps so both TensorCores get work.
        tl_cap = _round_up((length + 1) // 2, 128)
    else:
        tl_cap = _round_up(length, 128)
    tl_eff = min(tl, tl_cap)

    grid = (n, pl.cdiv(length, tl_eff))

    # Advisory cost hint for XLA scheduling around the custom call.
    cost = pl.CostEstimate(
        flops=2 * n * length * c_in * c_out,
        transcendentals=n * length * c_out,
        bytes_accessed=n * length * (c_in + c_out) * itemsize
        + c_out * c_in * itemsize + c_out * 4,
    )

    # Double-buffered input + output tiles, resident weight/bias, plus headroom.
    vmem_need = (2 * (c_in + c_out) * tl_eff * itemsize
                 + c_out * (c_in + 1) * 4 + (2 << 20))
    vmem_limit = int(min(max(vmem_need, 16 << 20), 48 << 20))

    out = pl.pallas_call(
        _proj_gelu_kernel,
        out_shape=jax.ShapeDtypeStruct((n, c_out, length), x_ncl.dtype),
        grid_spec=pltpu.PrefetchScalarGridSpec(
            num_scalar_prefetch=0,
            grid=grid,
            in_specs=[
                # (1, C_in, tl) block, batch dim squeezed -> kernel sees (C_in, tl).
                pl.BlockSpec((None, c_in, tl_eff), lambda b, l: (b, 0, l)),
                # Fully-resident weight / bias (constant index map -> fetched once).
                pl.BlockSpec((c_out, c_in), lambda b, l: (0, 0)),
                pl.BlockSpec((c_out, 1), lambda b, l: (0, 0)),
            ],
            out_specs=pl.BlockSpec((None, c_out, tl_eff), lambda b, l: (b, 0, l)),
        ),
        compiler_params=pltpu.CompilerParams(
            dimension_semantics=("parallel", "parallel"),
            vmem_limit_bytes=vmem_limit,
        ),
        cost_estimate=cost,
    )(x_ncl, wt, b2d)

    return out


def _reference(x_ncl, weight, bias):
    # Pure-JAX reference of ConvTranspose1d(k=1,s=1,p=0) + exact GELU.
    w2d = weight[:, :, 0]
    y = jnp.einsum("ncl,co->nol", x_ncl, w2d) + bias[None, :, None]
    return 0.5 * y * (1.0 + jax.lax.erf(y * _INV_SQRT2))


if __name__ == "__main__":
    key = jax.random.PRNGKey(0)
    k_x, k_w, k_b = jax.random.split(key, 3)

    batch, in_features, length = 2, 8, 16
    out_features = 16

    x = jax.random.normal(k_x, (batch, in_features, length), dtype=jnp.float32)
    # ConvTranspose1d weight shape: (in_channels, out_channels, kernel_size)
    bound = 1.0 / math.sqrt(in_features)  # PyTorch default init range
    weight = jax.random.uniform(
        k_w, (in_features, out_features, 1), minval=-bound, maxval=bound, dtype=jnp.float32
    )
    bias = jax.random.uniform(
        k_b, (out_features,), minval=-bound, maxval=bound, dtype=jnp.float32
    )

    out = conv_projection_layer(x, weight, bias)
    out = jax.block_until_ready(out)

    ref = _reference(x, weight, bias)
    assert out.shape == (batch, out_features, length)
    assert jnp.allclose(out, ref, atol=1e-5, rtol=1e-5), "mismatch vs reference"
    print("KERNEL_OK")
</pallas_src>

<mosaic_0001>
module attributes {stable_mosaic.version = 11 : i64} {
  func.func @_proj_gelu_kernel(%arg0: i32, %arg1: i32, %arg2: memref<1x8x128xf32, #tpu.memory_space<vmem>>, %arg3: memref<16x8xf32, #tpu.memory_space<vmem>>, %arg4: memref<16x1xf32, #tpu.memory_space<vmem>>, %arg5: memref<1x16x128xf32, #tpu.memory_space<vmem>>) attributes {dimension_semantics = [#tpu.dimension_semantics<parallel>, #tpu.dimension_semantics<parallel>], iteration_bounds = array<i64: 2, 1>, scalar_prefetch = 0 : i64, scratch_operands = 0 : i64, tpu.core_type = #tpu.core_type<tc>, window_params = [{transform_indices = @transform_0, window_bounds = array<i64: 1, 8, 128>}, {pipeline_mode = #tpu.pipeline_mode<synchronous>, transform_indices = @transform_1, window_bounds = array<i64: 16, 8>}, {pipeline_mode = #tpu.pipeline_mode<synchronous>, transform_indices = @transform_2, window_bounds = array<i64: 16, 1>}, {transform_indices = @transform_3, window_bounds = array<i64: 1, 16, 128>}]} {
    %c0 = arith.constant 0 : index
    %c0_0 = arith.constant 0 : index
    %0 = vector.load %arg3[%c0, %c0_0] : memref<16x8xf32, #tpu.memory_space<vmem>>, vector<16x8xf32>
    %c0_1 = arith.constant 0 : index
    %c0_2 = arith.constant 0 : index
    %c0_3 = arith.constant 0 : index
    %1 = vector.load %arg2[%c0_1, %c0_2, %c0_3] : memref<1x8x128xf32, #tpu.memory_space<vmem>>, vector<1x8x128xf32>
    %2 = vector.shape_cast %1 : vector<1x8x128xf32> to vector<8x128xf32>
    %cst = arith.constant dense<0.000000e+00> : vector<16x128xf32>
    %3 = tpu.matmul %0, %2, %cst {dimension_numbers = #tpu.dot_dimension_numbers<[1], [0], [0], [1], [0, 0, 1, 1], [], []>} : vector<16x8xf32>, vector<8x128xf32>, vector<16x128xf32> -> vector<16x128xf32>
    %c0_4 = arith.constant 0 : index
    %c0_5 = arith.constant 0 : index
    %4 = vector.load %arg4[%c0_4, %c0_5] : memref<16x1xf32, #tpu.memory_space<vmem>>, vector<16x1xf32>
    %5 = vector.broadcast %4 : vector<16x1xf32> to vector<16x128xf32>
    %6 = arith.addf %3, %5 : vector<16x128xf32>
    %cst_6 = arith.constant 5.000000e-01 : f32
    %7 = vector.broadcast %cst_6 : f32 to vector<16x128xf32>
    %8 = arith.mulf %7, %6 : vector<16x128xf32>
    %cst_7 = arith.constant 0.707106769 : f32
    %9 = vector.broadcast %cst_7 : f32 to vector<16x128xf32>
    %10 = arith.mulf %6, %9 : vector<16x128xf32>
    %11 = math.erf %10 : vector<16x128xf32>
    %cst_8 = arith.constant 1.000000e+00 : f32
    %12 = vector.broadcast %cst_8 : f32 to vector<16x128xf32>
    %13 = arith.addf %12, %11 : vector<16x128xf32>
    %14 = arith.mulf %8, %13 : vector<16x128xf32>
    %c0_9 = arith.constant 0 : index
    %c0_10 = arith.constant 0 : index
    %c0_11 = arith.constant 0 : index
    %15 = vector.load %arg5[%c0_9, %c0_10, %c0_11] : memref<1x16x128xf32, #tpu.memory_space<vmem>>, vector<1x16x128xf32>
    %16 = vector.shape_cast %15 : vector<1x16x128xf32> to vector<16x128xf32>
    %17 = vector.shape_cast %14 : vector<16x128xf32> to vector<1x16x128xf32>
    tpu.vector_store %arg5[%c0_9, %c0_10, %c0_11], %17 {strides = array<i32>} : memref<1x16x128xf32, #tpu.memory_space<vmem>>, vector<1x16x128xf32>,
    return
  }
  func.func @transform_0(%arg0: i32, %arg1: i32) -> (i32, i32, i32) {
    %c0_i32 = arith.constant 0 : i32
    %c0_i32_0 = arith.constant 0 : i32
    return %arg0, %c0_i32, %arg1 : i32, i32, i32
  }
  func.func @transform_1(%arg0: i32, %arg1: i32) -> (i32, i32) {
    %c0_i32 = arith.constant 0 : i32
    %c0_i32_0 = arith.constant 0 : i32
    %c0_i32_1 = arith.constant 0 : i32
    return %c0_i32, %c0_i32_0 : i32, i32
  }
  func.func @transform_2(%arg0: i32, %arg1: i32) -> (i32, i32) {
    %c0_i32 = arith.constant 0 : i32
    %c0_i32_0 = arith.constant 0 : i32
    %c0_i32_1 = arith.constant 0 : i32
    return %c0_i32, %c0_i32_0 : i32, i32
  }
  func.func @transform_3(%arg0: i32, %arg1: i32) -> (i32, i32, i32) {
    %c0_i32 = arith.constant 0 : i32
    %c0_i32_0 = arith.constant 0 : i32
    return %arg0, %c0_i32, %arg1 : i32, i32, i32
  }
}

</mosaic_0001>

<bundles_post_ra>
// kernel: conv_projection_layer.1
= control target key start
LH: loop header
LB: loop body
LE: loop exit
PB: predicated region body
PF: predicated region fallthrough
CT: control target
= control target key end

     0   :  { %8 = vsyncpa [#allocation3], 0  ;;  %s707_s0 = inlined_call_operand.vmem [shape: f32[2,8,16], index: 0, kind: input, shape index: {}]   ;;  %s708_s1 = inlined_call_operand.vmem [shape: f32[16,8], index: 1, kind: input, shape index: {}]   ;;  %s709_s2 = inlined_call_operand.vmem [shape: f32[16,1], index: 2, kind: input, shape index: {}]   ;;  %s710_s3 = inlined_call_operand.hbm [shape: f32[2,16,16], index: 3, kind: output, shape index: {}]  }
   0x1   :  { %10 = vsyncpa [#allocation3 + $0x1], 0  ;;  %s580_s12 = smov 0   ;;  %s582_s13 = smov 0  }
   0x2   :  { %s584_s14 = smov 0   ;;  %s586_s15 = smov 0  }
   0x3   :  { %s588_s16 = smov 0   ;;  %s590_s17 = smov 0  }
   0x4 LB: > { %s390_s18 = sadd.s32 4294967295, %s554_s17   ;;  %s391_s19 = sadd.s32 4294967294, %s554_s17   ;;  %s554_s17 = sphi %s590_s17, %s16_s17   ;;  %s550_s16 = sphi %s588_s16, %s717_s16   ;;  %s546_s15 = sphi %s586_s15, %s716_s15   ;;  %s542_s14 = sphi %s584_s14, %s715_s14   ;;  %s538_s13 = sphi %s582_s13, %s714_s13   ;;  %s534_s12 = sphi %s580_s12, %s713_s12  }
   0x5   : > { %s28_s20 = sadd.s32 1, %s550_s16  ;;  %s107_s21 = sadd.s32 1, %s542_s14 }
   0x6   : > { %p30_p0 = scmp.ge.s32.totalorder %s28_s20, 2  ;;  %p117_p1 = scmp.ne.s32.totalorder %s542_s14, %s538_s13 }
   0x7   : > { %p118_p2 = scmp.eq.s32.totalorder %s390_s18, 1  ;;  %p123_p3 = scmp.ne.s32.totalorder %s538_s13, %s534_s12 }
   0x8   : > { %s719_s20 = smov (%p30_p0, %s28_s20), 0  ;;  %p124_p5 = scmp.eq.s32.totalorder %s391_s19, 1 }
   0x9   : > { %p620_p4 = por %p118_p2, %p117_p1  ;;  %s102_s23 = ssub.s32 %s550_s16, %s719_s20 }
   0xa   : > { %p394_p6 = scmp.ge.s32.totalorder %s554_s17, 1  ;;  %p105_p7 = scmp.eq.s32.totalorder %s102_s23, 0 }
   0xb   : > { %p627_p8 = por %p124_p5, %p123_p3  ;;  %p158_p9 = scmp.lt.s32.totalorder %s554_s17, 3 }
   0xc   : > { %s633_s25 = scalar_select %p105_p7, %s542_s14, %s107_s21  }
   0xd   : > { %p159_p10 = pnand %p394_p6, %p158_p9 }
   0xe   : > { %p184_p11 = scmp.lt.s32.totalorder (!%p159_p10), %s546_s15, 1  ;;  %v191_v0 = vld [vmem:[%s708_s1] sm:$0xff] (!%p159_p10)  ;;  %vm206_vm0 = vcmask (!%p159_p10), 64512   ;;  %v556_v2 = vmov (!%p159_p10), 0   ;;  %v195_v3 = vld [vmem:[%s709_s2 + $0x8] sm:$0xff] (!%p159_p10)  ;;  %s181_s18 = sand.u32 (!%p159_p10), 1, %s538_s13  }
   0xf   : > { %162 = sbr.rel (%p159_p10) target bundleno = 276 (0x114), region = 32  ;;  %v194_v1 = vld [vmem:[%s709_s2] sm:$0xff] (!%p159_p10)  ;;  %410 = vmatprep.mubr.msk.f32.mxu0 (!%p159_p10), %vm206_vm0, %v191_v0  ;;  %471 = vset.pattern.permute.xlu0 (!%p159_p10), %v556_v2  ;;  %v192_v5 = vld [vmem:[%s708_s1 + $0x8] sm:$0xff] (!%p159_p10)  ;;  %s395_s19 = sshll.u32 (!%p159_p10), %s181_s18, 4 }
  0x10   : > { %198 = vperm.xlu0 (!%p159_p10), %471, %v194_v1   ;;  %s183_s21 = scalar_lea.vmem (!%p159_p10), [#allocation2], %s395_s19  ;;  %s404_s26 = sshll.u32 (!%p159_p10), %s546_s15, 8 }
  0x11   : > { %s315_s23 = sshll.u32 (!%p159_p10), %s183_s21, 4  ;;  %s659_s29 = scalar_lea.hbm (!%p159_p10), %s710_s3, %s404_s26  ;;  %s654_s23 = int_to_ptr.vmem [resolvable:$true] %s315_s23 }
  0x12   : > { %s557_s4 = smov (!%p159_p10), [#allocation2]  }
  0x13   : > { %s480_s5 = sshll.u32 (!%p159_p10), %s557_s4, 4  ;;  %s481_s5 = int_to_ptr.vmem [resolvable:$false] %s480_s5 }
  0x14   : > { %203 = vperm.xlu0 (!%p159_p10), %471, %v195_v3   ;;  %p483_p1 = scmp.lt.s32.totalorder (!%p159_p10), %s654_s23, %s481_s5 }
  0x16   : > { %s185_s30 = scalar_select %p184_p11, %s546_s15, 1 }
  0x17   : > { %s661_s15 = scalar_lea.sflag [#allocation3], %s181_s18 }
  0x18   : > { %s396_s6 = sshll.u32 %s185_s30, 3  ;;  %s476_s30 = scalar_lea.vmem %s654_s23, 256 }
  0x19   : > { %s190_s9 = scalar_lea.vmem %s707_s0, %s396_s6  ;;  %p477_p12 = scmp.ne.s32.totalorder %s654_s23, %s476_s30 }
  0x1a   : > { %v193_v4 = vld [vmem:[%s190_s9] sm:$0xff]  ;;  %s482_s6 = scalar_lea.vmem %s481_s5, 512 }
  0x1b   : > { %408 = vmatprep.subr.mxu0 %v193_v4  ;;  %p478_p13 = pnand %p477_p12, %p620_p4  ;;  %p484_p2 = scmp.lt.s32.totalorder %s482_s6, %s476_s30 }
  0x1c   : > { %409 = vmatpush3.msra.mxu0 %v193_v4 }
  0x1d   : > { %411 = vmatmul.mubr.msk.f32.vlgmr.msra.gmra.mrb[0].mxu0 %vm206_vm0, %v192_v5  ;;  %p479_p0 = pneg %p478_p13  ;;  %p485_p3 = por %p484_p2, %p483_p1 }
  0x1f   : > { %p486_p5 = pnand %p485_p3, %p479_p0 }
  0x8f   : > { %v199_v6 = vpop.permute.xlu0 %198 }
  0x93   : > { %v204_v7 = vpop.permute.xlu0 %203 }
  0xf0   : > { %v412_v8 = vpop.f32.mrb[0].mxu0 }
  0xf1   : > { %v285_v9 = vadd.f32 %v412_v8, %v204_v7  ;;  %v279_v10 = vpop.f32.mrb[1].mxu0 }
  0xf2   : > { %v280_v11 = vadd.f32 %v279_v10, %v199_v6 }
  0xf3   : > { %v291_v12 = vmul.f32 0.70710677, %v285_v9  ;;  %v289_v16 = vmul.f32 0.5, %v285_v9 }
  0xf4   : > { %v290_v13 = vmul.f32 0.70710677, %v280_v11  ;;  %v288_v18 = vmul.f32 0.5, %v280_v11 }
  0xf5   : > { %472 = verf.f32 %v291_v12 }
  0xf6   : > { %474 = verf.f32 %v290_v13 }
  0xff   : > { %v473_v14 = vpop.eup %472 }
 0x100   : > { %v475_v15 = vpop.eup %474  ;;  %v295_v17 = vadd.f32 1.0, %v473_v14 }
 0x101   : > { %v294_v19 = vadd.f32 1.0, %v475_v15 }
 0x102   : > { %v297_v20 = vmul.f32 %v295_v17, %v289_v16 }
 0x103   : > { %v296_v21 = vmul.f32 %v294_v19, %v288_v18 }
 0x104   : > { %299 = vst [vmem:[%s183_s21 + $0x8] sm:$0xff] %v297_v20 }
 0x105   : > { %298 = vst [vmem:[%s183_s21] sm:$0xff] %v296_v21 }
 0x106   : > { %489 = shalt.err (!%p486_p5)
}
 0x107   : > { %s490_s7 = scalar_lea.hbm %s659_s29, 256  ;;  %s494_s10 = scalar_lea.hbm %s710_s3, 512 }
 0x108   : > { %p491_p6 = scmp.ne.s32.totalorder %s659_s29, %s490_s7  ;;  %p495_p10 = scmp.lt.u32.totalorder %s659_s29, %s710_s3 }
 0x109   : > { %p496_p11 = scmp.lt.u32.totalorder %s494_s10, %s490_s7  ;;  %p498_p13 = scmp.lt.u32.totalorder %s490_s7, %s659_s29 }
 0x10a   : > { %p492_p7 = pnand %p491_p6, %p620_p4 }
 0x10b   : > { %p497_p12 = por %p496_p11, %p495_p10 }
 0x10c   : > { %p493_p9 = pneg %p492_p7 }
 0x10d   : > { %p499_p0 = por %p498_p13, %p497_p12 }
 0x10f   : > { %p500_p1 = pnand %p499_p0, %p493_p9 }
 0x111   : > { %503 = shalt.err (!%p500_p1)
}
 0x112   : > { %s558_s19 = smov 128   ;;  %s559_s21 = smov 8  }
 0x113   : > { %413 = dma.vmem_to_hbm [thread:$0]  (%p620_p4), %s654_s23, 256, %s659_s29, %s661_s15, %s558_s19, %s558_s19, %s559_s21  }
 0x114 PF: > { %p419_p2 = scmp.ge.s32.totalorder %s554_s17, 2  ;;  %s330_s26 = sand.u32 1, %s534_s12  }
 0x115   : > { %s331_s27 = scalar_lea.sflag [#allocation3], %s330_s26 }
 0x116   : > { %p416_p3 = pnand %p419_p2, %p627_p8 }
 0x118   : > { %529 = dma.done.wait (!%p416_p3), %s331_s27, 256  }
 0x119   : > { %531 = vsyncadd (!%p416_p3), %s331_s27, 4294967040  ;;  %s16_s17 = sadd.s32 1, %s554_s17   ;;  %s713_s12 = smov %s538_s13 }
 0x11a   : > { %p13_p5 = scmp.ge.s32.totalorder %s16_s17, 4   ;;  %s714_s13 = smov %s542_s14 }
 0x11b   : > { %s715_s14 = smov %s633_s25  ;;  %s716_s15 = smov %s550_s16 }
 0x11c   : > { %s717_s16 = smov %s719_s20  ;;  %15 = sbr.rel (!%p13_p5) target bundleno = 4 (0x4), region = 67 }
 0x123   :  { %336 = vsyncpa [#allocation3], 1 }
 0x124   :  { %338 = vsyncpa [#allocation3 + $0x1], 1 }

</bundles_post_ra>
